<compile_context>
chip_gen: v5e
topology: v5e:2x2
jax: 0.10.0
libtpu: 0.0.40
codegen_flags: <defaults>
</compile_context>

<pallas_src>
import jax
import jax.numpy as jnp
from jax import lax
from jax.experimental import pallas as pl
from jax.experimental.pallas import tpu as pltpu

_EPS = 1e-5
_MOMENTUM = 0.1


# --------------------------------------------------------------------------
# Kernels
# --------------------------------------------------------------------------
def _bf_batchnorm_train_kernel(x_ref, gamma_ref, run_sd_ref, y_ref,
                               new_run_sd_ref):
    # x_ref:          (N, C_t, HW)
    # gamma_ref:      (1, C_t, 1)
    # run_sd_ref:     (1, C_t, 1)
    # y_ref:          (N, C_t, HW)
    # new_run_sd_ref: (1, C_t, 1)
    x = x_ref[...].astype(jnp.float32)

    n, _, hw = x_ref.shape
    inv_count = 1.0 / float(n * hw)

    # One-sweep per-channel statistics (biased / unbiased=False variance).
    s1 = jnp.sum(x, axis=(0, 2), keepdims=True)            # (1, C_t, 1)
    s2 = jnp.sum(x * x, axis=(0, 2), keepdims=True)        # (1, C_t, 1)
    mean = s1 * inv_count
    var = jnp.maximum(s2 * inv_count - mean * mean, 0.0)    # guard cancellation

    gamma = gamma_ref[...].astype(jnp.float32)              # (1, C_t, 1)
    scale = gamma * lax.rsqrt(var + _EPS)                   # EUP rsqrt, no divide
    y_ref[...] = (x * scale).astype(y_ref.dtype)

    sd = jnp.sqrt(var + _EPS)                               # tiny (1, C_t, 1)
    run_sd = run_sd_ref[...].astype(jnp.float32)
    new_run_sd_ref[...] = (
        (1.0 - _MOMENTUM) * run_sd + _MOMENTUM * sd
    ).astype(new_run_sd_ref.dtype)


def _bf_batchnorm_eval_kernel(x_ref, gamma_ref, run_sd_ref, y_ref):
    # Eval mode: divide by the stored running_sd (no reduction over x).
    x = x_ref[...].astype(jnp.float32)
    gamma = gamma_ref[...].astype(jnp.float32)
    run_sd = run_sd_ref[...].astype(jnp.float32)
    scale = gamma * pl.reciprocal(run_sd, approx=False)     # (1, C_t, 1)
    y_ref[...] = (x * scale).astype(y_ref.dtype)


# --------------------------------------------------------------------------
# Wrapper
# --------------------------------------------------------------------------
def _choose_c_tile(n, c, hw, itemsize, vmem_budget_bytes=12 * 1024 * 1024):
    """Largest channel tile whose double-buffered x+y blocks fit the budget.

    Budget is conservative enough for v7x's 64 MiB physical VMEM while still
    giving large tiles on v5e/v6e.
    """
    bytes_per_channel = n * hw * itemsize
    # 2 (double buffer) * 2 (x-in block + y-out block) = 4 live copies.
    max_c = max(1, vmem_budget_bytes // (4 * bytes_per_channel))
    if c <= max_c:
        return c
    # A tiled (non-full) channel dim must be a multiple of 8 (sublane rule).
    return max((max_c // 8) * 8, 8)


def bf_batchnorm_forward(x_nchw, gammas, running_sd, training=True):
    """Forward of BF_batchNorm.

    Args:
      x_nchw:     (N, C, H, W)
      gammas:     (1, C, 1, 1)
      running_sd: (1, C, 1, 1)
      training:   training-mode (default, matches a freshly built nn.Module).
    Returns:
      y_nchw:          (N, C, H, W)
      new_running_sd:  (1, C, 1, 1)  (unchanged copy in eval mode)
    """
    n, c, h, w = x_nchw.shape
    hw = h * w
    itemsize = jnp.dtype(x_nchw.dtype).itemsize

    # Zero-copy reshapes; channels stay where they are in HBM.
    x3d = x_nchw.reshape(n, c, hw)
    gamma3d = gammas.reshape(1, c, 1)
    run_sd3d = running_sd.reshape(1, c, 1)

    c_tile = _choose_c_tile(n, c, hw, itemsize)
    grid = (pl.cdiv(c, c_tile),)

    # Scoped-VMEM limit derived from the actual tile (double-buffered x + y),
    # with headroom, clamped to a range safe on every chip generation.
    block_bytes = 4 * n * c_tile * hw * itemsize
    vmem_limit = int(min(max(block_bytes * 5 // 4 + (2 << 20), 32 << 20), 64 << 20))

    x_spec = pl.BlockSpec((n, c_tile, hw), lambda ci: (0, ci, 0))
    ch_spec = pl.BlockSpec((1, c_tile, 1), lambda ci: (0, ci, 0))
    cparams = pltpu.CompilerParams(
        dimension_semantics=("parallel",),
        vmem_limit_bytes=vmem_limit,
    )

    if training:
        y3d, new_run_sd3d = pl.pallas_call(
            _bf_batchnorm_train_kernel,
            out_shape=(
                jax.ShapeDtypeStruct((n, c, hw), x_nchw.dtype),
                jax.ShapeDtypeStruct((1, c, 1), running_sd.dtype),
            ),
            grid=grid,
            in_specs=[x_spec, ch_spec, ch_spec],
            out_specs=(x_spec, ch_spec),
            compiler_params=cparams,
        )(x3d, gamma3d, run_sd3d)
        new_running_sd = new_run_sd3d.reshape(1, c, 1, 1)
    else:
        y3d = pl.pallas_call(
            _bf_batchnorm_eval_kernel,
            out_shape=jax.ShapeDtypeStruct((n, c, hw), x_nchw.dtype),
            grid=grid,
            in_specs=[x_spec, ch_spec, ch_spec],
            out_specs=x_spec,
            compiler_params=cparams,
        )(x3d, gamma3d, run_sd3d)
        new_running_sd = running_sd

    return y3d.reshape(n, c, h, w), new_running_sd


# --------------------------------------------------------------------------
# Reference + self-test
# --------------------------------------------------------------------------
def _reference_forward(x, gammas, running_sd, training=True):
    # Pure-JAX reference matching the PyTorch forward.
    var = jnp.var(x, axis=(0, 2, 3), keepdims=True)  # unbiased=False
    sd = jnp.sqrt(var + _EPS)
    if training:
        y = (x / sd) * gammas
        new_run_sd = (1.0 - _MOMENTUM) * running_sd + _MOMENTUM * sd
        return y, new_run_sd
    y = (x / running_sd) * gammas
    return y, running_sd


if __name__ == "__main__":
    key = jax.random.PRNGKey(0)
    kx, kg = jax.random.split(key)

    N, C, H, W = 2, 4, 16, 16  # small NCHW input, num_kernels = C

    x = jax.random.normal(kx, (N, C, H, W), dtype=jnp.float32)

    # Deterministic parameter init mirroring the module's __init__:
    #   gammas ~ N(0,1) * (2/9/64), clamped to [-0.025, 0.025]
    #   running_sd = ones
    g = jax.random.normal(kg, (1, C, 1, 1), dtype=jnp.float32) * (2.0 / 9.0 / 64.0)
    gammas = jnp.clip(g, -0.025, 0.025)
    running_sd = jnp.ones((1, C, 1, 1), dtype=jnp.float32)

    # Training mode (module default).
    y, new_run_sd = bf_batchnorm_forward(x, gammas, running_sd, training=True)
    y = jax.block_until_ready(y)
    new_run_sd = jax.block_until_ready(new_run_sd)
    y_ref, run_sd_ref = _reference_forward(x, gammas, running_sd, training=True)
    assert jnp.allclose(y, y_ref, atol=1e-5, rtol=1e-5), "train output mismatch"
    assert jnp.allclose(new_run_sd, run_sd_ref, atol=1e-5, rtol=1e-5), (
        "running_sd mismatch"
    )

    # Eval mode.
    y_e, _ = bf_batchnorm_forward(x, gammas, new_run_sd, training=False)
    y_e = jax.block_until_ready(y_e)
    y_e_ref, _ = _reference_forward(x, gammas, new_run_sd, training=False)
    assert jnp.allclose(y_e, y_e_ref, atol=1e-5, rtol=1e-5), "eval output mismatch"

    print("KERNEL_OK")
</pallas_src>

<mosaic_0001>
module attributes {stable_mosaic.version = 11 : i64} {
  func.func @_bf_batchnorm_train_kernel(%arg0: i32, %arg1: memref<2x4x256xf32, #tpu.memory_space<vmem>>, %arg2: memref<1x4x1xf32, #tpu.memory_space<vmem>>, %arg3: memref<1x4x1xf32, #tpu.memory_space<vmem>>, %arg4: memref<2x4x256xf32, #tpu.memory_space<vmem>>, %arg5: memref<1x4x1xf32, #tpu.memory_space<vmem>>) attributes {dimension_semantics = [#tpu.dimension_semantics<parallel>], iteration_bounds = array<i64: 1>, scalar_prefetch = 0 : i64, scratch_operands = 0 : i64, tpu.core_type = #tpu.core_type<tc>, window_params = [{transform_indices = @transform_0, window_bounds = array<i64: 2, 4, 256>}, {transform_indices = @transform_1, window_bounds = array<i64: 1, 4, 1>}, {transform_indices = @transform_2, window_bounds = array<i64: 1, 4, 1>}, {transform_indices = @transform_3, window_bounds = array<i64: 2, 4, 256>}, {transform_indices = @transform_4, window_bounds = array<i64: 1, 4, 1>}]} {
    %c0 = arith.constant 0 : index
    %c0_0 = arith.constant 0 : index
    %c0_1 = arith.constant 0 : index
    %0 = vector.load %arg1[%c0, %c0_0, %c0_1] : memref<2x4x256xf32, #tpu.memory_space<vmem>>, vector<2x4x256xf32>
    %cst = arith.constant dense<0.000000e+00> : vector<4xf32>
    %1 = vector.multi_reduction <add>, %0, %cst [0, 2] : vector<2x4x256xf32> to vector<4xf32>
    %2 = vector.shape_cast %1 : vector<4xf32> to vector<1x4x1xf32>
    %3 = arith.mulf %0, %0 : vector<2x4x256xf32>
    %cst_2 = arith.constant dense<0.000000e+00> : vector<4xf32>
    %4 = vector.multi_reduction <add>, %3, %cst_2 [0, 2] : vector<2x4x256xf32> to vector<4xf32>
    %5 = vector.shape_cast %4 : vector<4xf32> to vector<1x4x1xf32>
    %cst_3 = arith.constant 0.001953125 : f32
    %6 = vector.broadcast %cst_3 : f32 to vector<1x4x1xf32>
    %7 = arith.mulf %2, %6 : vector<1x4x1xf32>
    %cst_4 = arith.constant 0.001953125 : f32
    %8 = vector.broadcast %cst_4 : f32 to vector<1x4x1xf32>
    %9 = arith.mulf %5, %8 : vector<1x4x1xf32>
    %10 = arith.mulf %7, %7 : vector<1x4x1xf32>
    %11 = arith.subf %9, %10 : vector<1x4x1xf32>
    %cst_5 = arith.constant 0.000000e+00 : f32
    %12 = vector.broadcast %cst_5 : f32 to vector<1x4x1xf32>
    %13 = arith.maximumf %11, %12 : vector<1x4x1xf32>
    %c0_6 = arith.constant 0 : index
    %c0_7 = arith.constant 0 : index
    %c0_8 = arith.constant 0 : index
    %14 = vector.load %arg2[%c0_6, %c0_7, %c0_8] : memref<1x4x1xf32, #tpu.memory_space<vmem>>, vector<1x4x1xf32>
    %cst_9 = arith.constant 9.99999974E-6 : f32
    %15 = vector.broadcast %cst_9 : f32 to vector<1x4x1xf32>
    %16 = arith.addf %13, %15 : vector<1x4x1xf32>
    %17 = math.rsqrt %16 : vector<1x4x1xf32>
    %18 = arith.mulf %14, %17 : vector<1x4x1xf32>
    %19 = vector.broadcast %18 : vector<1x4x1xf32> to vector<2x4x256xf32>
    %20 = arith.mulf %0, %19 : vector<2x4x256xf32>
    %c0_10 = arith.constant 0 : index
    %c0_11 = arith.constant 0 : index
    %c0_12 = arith.constant 0 : index
    %21 = vector.load %arg4[%c0_10, %c0_11, %c0_12] : memref<2x4x256xf32, #tpu.memory_space<vmem>>, vector<2x4x256xf32>
    tpu.vector_store %arg4[%c0_10, %c0_11, %c0_12], %20 {strides = array<i32>} : memref<2x4x256xf32, #tpu.memory_space<vmem>>, vector<2x4x256xf32>,
    %cst_13 = arith.constant 9.99999974E-6 : f32
    %22 = vector.broadcast %cst_13 : f32 to vector<1x4x1xf32>
    %23 = arith.addf %13, %22 : vector<1x4x1xf32>
    %24 = math.sqrt %23 : vector<1x4x1xf32>
    %c0_14 = arith.constant 0 : index
    %c0_15 = arith.constant 0 : index
    %c0_16 = arith.constant 0 : index
    %25 = vector.load %arg3[%c0_14, %c0_15, %c0_16] : memref<1x4x1xf32, #tpu.memory_space<vmem>>, vector<1x4x1xf32>
    %cst_17 = arith.constant 0.899999976 : f32
    %26 = vector.broadcast %cst_17 : f32 to vector<1x4x1xf32>
    %27 = arith.mulf %26, %25 : vector<1x4x1xf32>
    %cst_18 = arith.constant 1.000000e-01 : f32
    %28 = vector.broadcast %cst_18 : f32 to vector<1x4x1xf32>
    %29 = arith.mulf %28, %24 : vector<1x4x1xf32>
    %30 = arith.addf %27, %29 : vector<1x4x1xf32>
    %c0_19 = arith.constant 0 : index
    %c0_20 = arith.constant 0 : index
    %c0_21 = arith.constant 0 : index
    %31 = vector.load %arg5[%c0_19, %c0_20, %c0_21] : memref<1x4x1xf32, #tpu.memory_space<vmem>>, vector<1x4x1xf32>
    tpu.vector_store %arg5[%c0_19, %c0_20, %c0_21], %30 {strides = array<i32>} : memref<1x4x1xf32, #tpu.memory_space<vmem>>, vector<1x4x1xf32>,
    return
  }
  func.func @transform_0(%arg0: i32) -> (i32, i32, i32) {
    %c0_i32 = arith.constant 0 : i32
    %c0_i32_0 = arith.constant 0 : i32
    %c0_i32_1 = arith.constant 0 : i32
    return %c0_i32, %arg0, %c0_i32_0 : i32, i32, i32
  }
  func.func @transform_1(%arg0: i32) -> (i32, i32, i32) {
    %c0_i32 = arith.constant 0 : i32
    %c0_i32_0 = arith.constant 0 : i32
    %c0_i32_1 = arith.constant 0 : i32
    return %c0_i32, %arg0, %c0_i32_0 : i32, i32, i32
  }
  func.func @transform_2(%arg0: i32) -> (i32, i32, i32) {
    %c0_i32 = arith.constant 0 : i32
    %c0_i32_0 = arith.constant 0 : i32
    %c0_i32_1 = arith.constant 0 : i32
    return %c0_i32, %arg0, %c0_i32_0 : i32, i32, i32
  }
  func.func @transform_3(%arg0: i32) -> (i32, i32, i32) {
    %c0_i32 = arith.constant 0 : i32
    %c0_i32_0 = arith.constant 0 : i32
    %c0_i32_1 = arith.constant 0 : i32
    return %c0_i32, %arg0, %c0_i32_0 : i32, i32, i32
  }
  func.func @transform_4(%arg0: i32) -> (i32, i32, i32) {
    %c0_i32 = arith.constant 0 : i32
    %c0_i32_0 = arith.constant 0 : i32
    %c0_i32_1 = arith.constant 0 : i32
    return %c0_i32, %arg0, %c0_i32_0 : i32, i32, i32
  }
}

</mosaic_0001>

<bundles_post_ra>
// kernel: tpu_custom_call.1
= control target key start
LH: loop header
LB: loop body
LE: loop exit
PB: predicated region body
PF: predicated region fallthrough
CT: control target
= control target key end

     0   :  { %10 = vsyncpa [#allocation3], 0  ;;  %s288_s0 = inlined_call_operand.hbm [shape: f32[2,4,256], index: 0, kind: input, shape index: {}]   ;;  %s289_s1 = inlined_call_operand.vmem [shape: f32[1,4,1], index: 1, kind: input, shape index: {}]   ;;  %s290_s2 = inlined_call_operand.vmem [shape: f32[1,4,1], index: 2, kind: input, shape index: {}]   ;;  %s291_s3 = inlined_call_operand.hbm [shape: f32[2,4,256], index: 3, kind: output, shape index: {0}]   ;;  %s292_s4 = inlined_call_operand.vmem [shape: f32[1,4,1], index: 4, kind: output, shape index: {1}]  }
   0x1   :  { %11 = vsyncpa [#allocation4], 0  ;;  %s16_s17 = sshll.u32 %s288_s0, 4  ;;  %s216_s18 = smov [#allocation2]   ;;  %s17_s17 = int_to_ptr.hbm [resolvable:$true] %s16_s17 }
   0x2   :  { %s18_s19 = sshll.u32 %s216_s18, 4  ;;  %s217_s20 = smov 128   ;;  %s19_s19 = int_to_ptr.vmem [resolvable:$true] %s18_s19 }
   0x3   :  { %s218_s21 = smov 8  }
   0x4   :  { %24 = dma.hbm_to_vmem [thread:$0]  %s17_s17, 256, %s19_s19, [#allocation3], %s217_s20, %s217_s20, %s218_s21  }
   0x5   :  { %212 = dma.done.wait [#allocation3], 256  }
   0x6   :  { %213 = vsyncadd [#allocation3], 4294967040  ;;  %v253_v0 = vld [vmem:[#allocation2] sm:$0xff]  ;;  %v255_v1 = vld [vmem:[#allocation2 + $0x8] sm:$0xff]  ;;  %vm48_vm0 = vcmask 1043456   ;;  %v219_v26 = vmov 0  }
   0x7   :  { %37 = vst [vmem:[#allocation1] ss:$2 sm:$0xff] %v253_v0  ;;  %v58_v2 = vmul.f32 %v253_v0, %v253_v0  ;;  %v59_v3 = vmul.f32 %v255_v1, %v255_v1  ;;  %160 = vset.pattern.permute.xlu1 %v219_v26  ;;  %161 = vset.pattern.permute.xlu0 %v219_v26  ;;  %v87_v40 = vld [vmem:[%s289_s1] sm:$0xf]  ;;  %vm129_vm6 = vcmask 3072   ;;  %s137_s29 = sshll.u32 %s291_s3, 4  ;;  %s138_s29 = int_to_ptr.hbm [resolvable:$true] %s137_s29 }
   0x8   :  { %41 = vst [vmem:[#allocation1 + $0x10] ss:$2 sm:$0xff] %v255_v1  ;;  %v125_v42 = vld [vmem:[%s290_s2] sm:$0xf]  ;;  %v220_v52 = vmov 839922192  }
   0x9   :  { %v126_v48 = vmul.f32 0.9, %v125_v42  ;;  %v105_v53 = vunpack.c.l.s4 %v220_v52  ;;  %s221_s2 = smov [#allocation5]  }
   0xa   :  { %s135_s26 = sshll.u32 %s221_s2, 4  ;;  %s136_s26 = int_to_ptr.vmem [resolvable:$true] %s135_s26 }
   0xb   :  { %v106_v54 = vunpack.c.0.s8 %v105_v53 }
   0xe   :  { %v38_v4 = vld.sshfl [vmem:[#allocation1] sm:$0xff pattern:$0x75316420]  ;;  %v39_v5 = vld.sshfl [vmem:[#allocation1 + $0x8] sm:$0xff pattern:$0x75316420] }
   0xf   :  { %v42_v6 = vld.sshfl [vmem:[#allocation1 + $0x10] sm:$0xff pattern:$0x75316420]  ;;  %v43_v7 = vld.sshfl [vmem:[#allocation1 + $0x18] sm:$0xff pattern:$0x75316420] }
  0x10   :  { %v49_v8 = vsel %vm48_vm0, %v38_v4, 0.0  ;;  %v50_v9 = vsel %vm48_vm0, %v39_v5, 0.0  ;;  %v52_v10 = vsel %vm48_vm0, %v42_v6, 0.0  ;;  %62 = vst [vmem:[#allocation1] ss:$2 sm:$0xff] %v58_v2  ;;  %v54_v12 = vsel %vm48_vm0, %v43_v7, 0.0 }
  0x11   :  { %v51_v11 = vadd.f32 %v50_v9, %v49_v8  ;;  %66 = vst [vmem:[#allocation1 + $0x10] ss:$2 sm:$0xff] %v59_v3 }
  0x13   :  { %v53_v13 = vadd.f32 %v52_v10, %v51_v11 }
  0x15   :  { %v55_v14 = vadd.f32 %v54_v12, %v53_v13 }
  0x17   :  { %56 = vadd.xlane.f32.xlu0 %v55_v14  ;;  %v63_v15 = vld.sshfl [vmem:[#allocation1] sm:$0xff pattern:$0x75316420]  ;;  %v64_v16 = vld.sshfl [vmem:[#allocation1 + $0x8] sm:$0xff pattern:$0x75316420] }
  0x18   :  { %v67_v17 = vld.sshfl [vmem:[#allocation1 + $0x10] sm:$0xff pattern:$0x75316420]  ;;  %v68_v18 = vld.sshfl [vmem:[#allocation1 + $0x18] sm:$0xff pattern:$0x75316420] }
  0x19   :  { %v73_v19 = vsel %vm48_vm0, %v63_v15, 0.0  ;;  %v74_v20 = vsel %vm48_vm0, %v64_v16, 0.0  ;;  %v76_v21 = vsel %vm48_vm0, %v67_v17, 0.0  ;;  %v78_v23 = vsel %vm48_vm0, %v68_v18, 0.0 }
  0x1a   :  { %v75_v22 = vadd.f32 %v74_v20, %v73_v19 }
  0x1c   :  { %v77_v24 = vadd.f32 %v76_v21, %v75_v22 }
  0x1e   :  { %v79_v25 = vadd.f32 %v78_v23, %v77_v24 }
  0x20   :  { %80 = vadd.xlane.f32.xlu0 %v79_v25 }
  0x8a   :  { %v57_v27 = vpop.xlane.xlu0 %56 }
  0x8b   :  { %v82_v28 = vmul.f32 0.001953125, %v57_v27 }
  0x8d   :  { %v84_v30 = vmul.f32 %v82_v28, %v82_v28 }
  0x93   :  { %v81_v29 = vpop.xlane.xlu0 %80 }
  0x94   :  { %v83_v31 = vmul.f32 0.001953125, %v81_v29 }
  0x96   :  { %v85_v32 = vsub.f32 %v83_v31, %v84_v30 }
  0x98   :  { %v86_v33 = vmax.f32 %v85_v32, 0.0 }
  0x9a   :  { %v88_v34 = vadd.f32 1e-05, %v86_v33 }
  0x9c   :  { %162 = vrsqrt.f32 %v88_v34  ;;  %vm95_vm2 = vweird.f32 %v88_v34  ;;  %vm120_vm4 = vcmp.eq.f32.partialorder %v88_v34, inf  ;;  %v123_v46 = vand.u32 2147483648, %v88_v34 }
  0x9d   :  { %vm122_vm5 = vcmp.eq.f32.partialorder %v88_v34, 0.0 }
  0xa2   :  { %v163_v35 = vpop.eup %162 }
  0xa3   :  { %v90_v36 = vmul.f32 %v163_v35, %v88_v34  ;;  %vm96_vm1 = vweird.f32 %v163_v35 }
  0xa4   :  { %vm97_vm3 = vmor %vm95_vm2, %vm96_vm1 }
  0xa5   :  { %v91_v37 = vmul.f32 %v163_v35, %v90_v36 }
  0xa7   :  { %v92_v38 = vmul.f32 0.5, %v91_v37 }
  0xa9   :  { %v93_v39 = vsub.f32 1.5, %v92_v38 }
  0xab   :  { %v94_v41 = vmul.f32 %v163_v35, %v93_v39 }
  0xad   :  { %v98_v43 = vsel %vm97_vm3, %v163_v35, %v94_v41  ;;  %v119_v44 = vmul.f32 %v94_v41, %v88_v34 }
  0xae   :  { %v99_v45 = vmul.f32 %v98_v43, %v87_v40 }
  0xaf   :  { %v121_v47 = vsel %vm120_vm4, %v88_v34, %v119_v44 }
  0xb0   :  { %v124_v49 = vsel %vm122_vm5, %v123_v46, %v121_v47  ;;  %102 = vperm.xlu1 %160, %v99_v45  }
  0xb1   :  { %v127_v50 = vmul.f32 0.1, %v124_v49 }
  0xb3   :  { %v128_v51 = vadd.f32 %v127_v50, %v126_v48 }
  0xb5   :  { %130 = vst.msk [vmem:[%s292_s4] sm:$0xf] %vm129_vm6, %v128_v51 }
 0x122   :  { %v103_v55 = vpop.permute.xlu1 %102 }
 0x123   :  { %v107_v56 = vperm.slane %v103_v55, %v106_v54 }
 0x125   :  { %v109_v57 = vmul.f32 %v107_v56, %v253_v0  ;;  %v110_v58 = vmul.f32 %v107_v56, %v255_v1 }
 0x127   :  { %111 = vst [vmem:[#allocation5] sm:$0xff] %v109_v57 }
 0x128   :  { %112 = vst [vmem:[#allocation5 + $0x8] sm:$0xff] %v110_v58 }
 0x129   :  { %143 = dma.vmem_to_hbm [thread:$0]  %s136_s26, 256, %s138_s29, [#allocation4], %s217_s20, %s217_s20, %s218_s21  }
 0x12a   :  { %214 = dma.done.wait [#allocation4], 256  }
 0x12b   :  { %215 = vsyncadd [#allocation4], 4294967040 }
 0x12c   :  { %152 = vsyncpa [#allocation3], 1 }
 0x12d   :  { %153 = vsyncpa [#allocation4], 1 }

</bundles_post_ra>
